<compile_context>
chip_gen: v7x
topology: tpu7x:2x2x1
jax: 0.10.0
libtpu: 0.0.40
codegen_flags: <defaults>
</compile_context>

<pallas_src>
import functools
import math

import jax
import jax.numpy as jnp
from jax.experimental import pallas as pl
from jax.experimental.pallas import tpu as pltpu

_LANE = 128     # TPU lane width (last dim)
_SUBLANE = 8    # f32 sublane width (second-to-last dim)


def _round_up(x, m):
    return (x + m - 1) // m * m


def _vmem_budget_bytes():
    """Per-generation VMEM budget (<= ~75% of physical; capped for v5e/v6e)."""
    cap = 128 * 1024 * 1024
    try:
        cap = int(pltpu.get_tpu_info().vmem_capacity_bytes)
    except Exception:
        pass  # fall back to a conservative default
    return min(cap * 3 // 4, 96 * 1024 * 1024)


def _pick_h_tile(h_pad, d_in, weight_budget_bytes):
    """Largest lane-multiple divisor of h_pad whose double-buffered bf16 gate-weight block fits."""
    max_cols = max(_LANE, weight_budget_bytes // (2 * 4 * d_in * 2))  # 2 bufs * 4 gates * bf16
    m = h_pad // _LANE
    best = _LANE
    for kk in range(1, m + 1):
        if m % kk == 0 and _LANE * kk <= max_cols:
            best = _LANE * kk
    return best


def _pick_vocab_tile(nwords, h_pad, weight_budget_bytes):
    """Adaptive vocab tile: large, lane-dense, double-buffered bf16 weight block within budget."""
    v_pad = _round_up(nwords, _LANE)
    max_cols = max(_LANE, weight_budget_bytes // (2 * h_pad * 2))     # 2 bufs * bf16
    vt = max(_LANE, min(4096, (max_cols // _LANE) * _LANE))
    if v_pad <= vt:
        return v_pad, v_pad
    # TODO(synk): for v7x megacore, prefer an even tile count for perfectly balanced core split.
    v_pad = _round_up(v_pad, vt)
    return vt, v_pad


# ---------------------------------------------------------------------------
# Kernel 1: fused embedding gather + multi-layer LSTM single step.
# Grid: (nlayers, n_hidden_tiles) -- both "arbitrary" (xh/hnext scratch carry).
# ---------------------------------------------------------------------------
def _lstm_stack_kernel(tok_ref,         # SMEM (b_pad,) int32   [scalar prefetch]
                       emb_hbm,         # HBM  (nwords, e_pad)  f32
                       w_ref,           # VMEM (d_in, 4*h_tile) bf16  (current layer / h tile)
                       b_ref,           # VMEM (1, 4*h_tile)    f32
                       h_in_ref,        # VMEM (b_pad, h_pad)   f32  (full layer, resident over j)
                       c_in_ref,        # VMEM (b_pad, h_tile)  f32  (current h tile)
                       h_out_ref,       # VMEM (b_pad, h_tile)  f32
                       c_out_ref,       # VMEM (b_pad, h_tile)  f32
                       xh_ref,          # VMEM scratch (b_pad, d_in) f32  (persists over grid)
                       hnext_ref,       # VMEM scratch (b_pad, h_pad) f32 (persists over grid)
                       gather_sem,      # DMA semaphores (b_pad,)
                       *, batch, b_pad, e_pad, x_dim, h_pad, h_tile, nwords):
    layer = pl.program_id(0)
    jt = pl.program_id(1)

    # ---- Layer 0 start: DMA-gather embedding rows into the x slot of [x | h]. ----
    @pl.when(jnp.logical_and(layer == 0, jt == 0))
    def _init_first_layer():
        # Issue the gathers first so they overlap the stores below.
        copies = []
        for b in range(batch):
            # Clamp the token id: an out-of-range id becomes a defined (wrong) row instead of
            # a hard DMA fault.
            tok = jnp.minimum(jnp.maximum(tok_ref[b], 0), nwords - 1)
            cp = pltpu.make_async_copy(
                emb_hbm.at[pl.ds(tok, 1), :],
                xh_ref.at[pl.ds(b, 1), pl.ds(0, e_pad)],
                gather_sem.at[b])
            cp.start()
            copies.append(cp)
        # Overlap with the in-flight DMAs: write the h slot of the operand.
        xh_ref[:, x_dim:x_dim + h_pad] = h_in_ref[...]
        # Zero only the true padding regions of the x slot (they do not overlap the DMA
        # destinations, so there is no ordering hazard).
        if e_pad < x_dim:
            xh_ref[:, e_pad:x_dim] = jnp.zeros((b_pad, x_dim - e_pad), jnp.float32)
        if batch < b_pad:
            xh_ref[batch:b_pad, 0:e_pad] = jnp.zeros((b_pad - batch, e_pad), jnp.float32)
        for cp in copies:
            cp.wait()

    # ---- Layer l>0 start: previous layer's hidden output becomes this layer's x. ----
    @pl.when(jnp.logical_and(layer > 0, jt == 0))
    def _advance_layer():
        # TODO(synk): inter-layer dropout is identity in eval mode; training masks not implemented.
        xh_ref[:, 0:h_pad] = hnext_ref[...]
        if x_dim > h_pad:
            # Explicitly clear the slab that would otherwise hold stale layer-0 embedding data
            # (harmless anyway because the matching weight rows are zero, but hardened).
            xh_ref[:, h_pad:x_dim] = jnp.zeros((b_pad, x_dim - h_pad), jnp.float32)
        xh_ref[:, x_dim:x_dim + h_pad] = h_in_ref[...]

    # ---- Fused gate matmul for this hidden-column tile (bf16 MXU, f32 accumulate). ----
    xh_bf = xh_ref[...].astype(jnp.bfloat16)
    gates = (jnp.dot(xh_bf, w_ref[...], preferred_element_type=jnp.float32)
             + b_ref[...])

    # PyTorch gate order i, f, g, o; h_tile is a multiple of 128 so every slice is lane-aligned.
    i_g = jax.nn.sigmoid(gates[:, 0 * h_tile:1 * h_tile])
    f_g = jax.nn.sigmoid(gates[:, 1 * h_tile:2 * h_tile])
    g_g = jnp.tanh(gates[:, 2 * h_tile:3 * h_tile])
    o_g = jax.nn.sigmoid(gates[:, 3 * h_tile:4 * h_tile])

    c_new = f_g * c_in_ref[...] + i_g * g_g
    h_new = o_g * jnp.tanh(c_new)

    h_out_ref[...] = h_new
    c_out_ref[...] = c_new

    # Stash this layer's hidden output; it feeds the next layer's x slot.  (Note: padded batch
    # rows carry bias-driven garbage but never mix with real rows; padded hidden columns stay 0.)
    @pl.when(layer + 1 < pl.num_programs(0))
    def _stash_h():
        col0 = pl.multiple_of(jt * h_tile, h_tile)
        hnext_ref[:, pl.ds(col0, h_tile)] = h_new


def _lstm_stack(tok_pad, emb_pad, w_all, b_all, h_in, c_in,
                *, batch, e_pad, x_dim, h_pad, h_tile, nwords, vmem_budget):
    nlayers, b_pad, _ = h_in.shape
    d_in = x_dim + h_pad
    n_ht = h_pad // h_tile
    kernel = functools.partial(_lstm_stack_kernel, batch=batch, b_pad=b_pad, e_pad=e_pad,
                               x_dim=x_dim, h_pad=h_pad, h_tile=h_tile, nwords=nwords)

    full_state_spec = pl.BlockSpec((None, b_pad, h_pad), lambda l, j, tok: (l, 0, 0))
    tile_state_spec = pl.BlockSpec((None, b_pad, h_tile), lambda l, j, tok: (l, 0, j))

    flops = int(2 * nlayers * b_pad * d_in * 4 * h_pad)
    transcendentals = int(5 * nlayers * b_pad * h_pad)
    bytes_accessed = int(2 * w_all.size + 4 * b_all.size
                         + 4 * (4 * nlayers * b_pad * h_pad + batch * e_pad))

    # VMEM budget computed from actual block sizes (double buffered) + persistent scratch.
    need = (2 * (d_in * 4 * h_tile * 2                    # packed W block, bf16
                 + _SUBLANE * 4 * h_tile * 4              # bias block (sublane padded)
                 + b_pad * h_pad * 4                      # h_in block (full layer)
                 + 3 * b_pad * h_tile * 4)                # c_in + h_out + c_out blocks
            + b_pad * d_in * 4 + b_pad * h_pad * 4)       # xh + hnext scratch
    vmem_limit = min(max(32 * 1024 * 1024, int(need * 1.5) + (4 << 20)), vmem_budget)

    # TODO(synk): in an autoregressive loop, alias h_in/c_in to the outputs
    # (input_output_aliases) so XLA reuses the state buffers in place.
    return pl.pallas_call(
        kernel,
        grid_spec=pltpu.PrefetchScalarGridSpec(
            num_scalar_prefetch=1,
            grid=(nlayers, n_ht),
            in_specs=[
                pl.BlockSpec(memory_space=pl.ANY),                                    # emb (HBM)
                pl.BlockSpec((None, d_in, 4 * h_tile), lambda l, j, tok: (l, 0, j)),  # packed W
                pl.BlockSpec((None, 1, 4 * h_tile), lambda l, j, tok: (l, 0, j)),     # packed bias
                full_state_spec,                                                      # h_in
                tile_state_spec,                                                      # c_in
            ],
            out_specs=(tile_state_spec, tile_state_spec),
            scratch_shapes=[
                pltpu.VMEM((b_pad, d_in), jnp.float32),      # [x | h] operand
                pltpu.VMEM((b_pad, h_pad), jnp.float32),     # next layer's x
                pltpu.SemaphoreType.DMA((b_pad,)),
            ]),
        out_shape=(jax.ShapeDtypeStruct((nlayers, b_pad, h_pad), jnp.float32),
                   jax.ShapeDtypeStruct((nlayers, b_pad, h_pad), jnp.float32)),
        compiler_params=pltpu.CompilerParams(
            # Both axes are serial: the layer carry and the shared xh scratch live in core-local VMEM.
            dimension_semantics=("arbitrary", "arbitrary"),
            vmem_limit_bytes=vmem_limit),
        cost_estimate=pl.CostEstimate(flops=flops,
                                      transcendentals=transcendentals,
                                      bytes_accessed=bytes_accessed),
    )(tok_pad, emb_pad, w_all, b_all, h_in, c_in)


# ---------------------------------------------------------------------------
# Kernel 2: projection, tiled over the vocab dimension (lane-dense output blocks).
# ---------------------------------------------------------------------------
def _projection_kernel(h_ref, wp_ref, bp_ref, out_ref):
    out_ref[...] = (jnp.dot(h_ref[...].astype(jnp.bfloat16), wp_ref[...],
                            preferred_element_type=jnp.float32)
                    + bp_ref[...])


def _projection(h_all, wp_pad, bp_pad, *, vocab_tile, vmem_budget):
    nlayers, b_pad, h_pad = h_all.shape
    v_pad = wp_pad.shape[1]
    grid = (v_pad // vocab_tile,)

    flops = int(2 * b_pad * h_pad * v_pad)
    bytes_accessed = int(2 * h_pad * v_pad + 4 * (v_pad + b_pad * h_pad + b_pad * v_pad))

    need = 2 * (h_pad * vocab_tile * 2            # wp block (bf16), double buffered
                + _SUBLANE * vocab_tile * 4       # bias block
                + b_pad * vocab_tile * 4          # out block
                + b_pad * h_pad * 4)              # h block
    vmem_limit = min(max(32 * 1024 * 1024, int(need * 1.5) + (4 << 20)), vmem_budget)

    return pl.pallas_call(
        _projection_kernel,
        grid=grid,
        in_specs=[
            # top layer's hidden state, resident across all vocab tiles
            pl.BlockSpec((None, b_pad, h_pad), lambda j: (nlayers - 1, 0, 0)),
            pl.BlockSpec((h_pad, vocab_tile), lambda j: (0, j)),
            pl.BlockSpec((1, vocab_tile), lambda j: (0, j)),
        ],
        out_specs=pl.BlockSpec((b_pad, vocab_tile), lambda j: (0, j)),
        out_shape=jax.ShapeDtypeStruct((b_pad, v_pad), jnp.float32),
        compiler_params=pltpu.CompilerParams(
            dimension_semantics=("parallel",),      # only parallel axis -> v7x megacore split
            vmem_limit_bytes=vmem_limit),
        cost_estimate=pl.CostEstimate(flops=flops, transcendentals=0,
                                      bytes_accessed=bytes_accessed),
    )(h_all, wp_pad, bp_pad)


# ---------------------------------------------------------------------------
# Decoder forward (matches torch Decoder.forward semantics, eval mode)
# ---------------------------------------------------------------------------
def decoder_forward_padded(params, tok_pad, h_in_pad, c_in_pad, *, batch=None):
    """Padded-state entry point for autoregressive loops (no per-step pad/slice XLA ops).

    tok_pad: (b_pad,) int32; h_in_pad/c_in_pad: (nlayers, b_pad, h_pad) f32 with zero padding.
    Returns (logits_pad (b_pad, v_pad), h_out_pad, c_out_pad).
    """
    dims = params["dims"]
    if batch is None:
        batch = int(tok_pad.shape[0])
    h_out, c_out = _lstm_stack(tok_pad, params["embedding"], params["w_all"],
                               params["b_all"], h_in_pad, c_in_pad,
                               batch=batch, e_pad=dims["e_pad"], x_dim=dims["x_dim"],
                               h_pad=dims["h_pad"], h_tile=dims["h_tile"],
                               nwords=dims["nwords"], vmem_budget=dims["vmem_budget"])
    logits_pad = _projection(h_out, params["wp_t"], params["bp"],
                             vocab_tile=dims["vocab_tile"], vmem_budget=dims["vmem_budget"])
    return logits_pad, h_out, c_out


def decoder_forward(params, trg_words, in_hidden, in_cell):
    """
    trg_words: (B,) int32 token ids
    in_hidden, in_cell: (nlayers, B, hidden) float32
    returns (logits (B, nwords), out_hidden, out_cell)
    """
    dims = params["dims"]
    H, V = dims["hidden"], dims["nwords"]
    h_pad, nlayers = dims["h_pad"], dims["nlayers"]

    B = int(trg_words.shape[0])
    b_pad = _round_up(max(B, 1), _SUBLANE)

    tok = jnp.zeros((b_pad,), jnp.int32).at[:B].set(trg_words.astype(jnp.int32))
    h_in = jnp.zeros((nlayers, b_pad, h_pad), jnp.float32).at[:, :B, :H].set(in_hidden)
    c_in = jnp.zeros((nlayers, b_pad, h_pad), jnp.float32).at[:, :B, :H].set(in_cell)

    logits_pad, h_out, c_out = decoder_forward_padded(params, tok, h_in, c_in, batch=B)

    return (logits_pad[:B, :V],
            h_out[:, :B, :H],
            c_out[:, :B, :H])


# ---------------------------------------------------------------------------
# Deterministic parameter construction (mirrors the torch __init__ inits)
# ---------------------------------------------------------------------------
def make_params(key, nwords, emb_size, hidden_size, nlayers):
    e_pad = _round_up(emb_size, _LANE)
    h_pad = _round_up(hidden_size, _LANE)
    # TODO(synk): when e_pad > h_pad, layers > 0 stream (e_pad - h_pad) zero weight rows;
    # a per-layer input width would trim that wasted bandwidth.
    x_dim = max(e_pad, h_pad)
    d_in = x_dim + h_pad

    vmem_budget = _vmem_budget_bytes()
    h_tile = _pick_h_tile(h_pad, d_in, vmem_budget // 3)
    vocab_tile, v_pad = _pick_vocab_tile(nwords, h_pad, vmem_budget // 2)
    n_ht = h_pad // h_tile

    keys = iter(jax.random.split(key, 4 + 4 * nlayers))
    k = 1.0 / math.sqrt(hidden_size)
    H = hidden_size

    # Embedding: uniform(-0.25, 0.25), zero-padded to a lane multiple.  Kept f32: only `batch`
    # rows are gathered per step, so it is not on the weight-streaming critical path.
    emb = jax.random.uniform(next(keys), (nwords, emb_size), jnp.float32, -0.25, 0.25)
    emb_pad = jnp.zeros((nwords, e_pad), jnp.float32).at[:, :emb_size].set(emb)

    # Packed per-layer weight (bf16): rows [0:in_dim) = Wih^T, rows [x_dim:x_dim+H) = Whh^T.
    # Columns are grouped hidden-tile-major then gate-major: col = j*4*h_tile + g*h_tile + c,
    # so each (d_in, 4*h_tile) block holds all 4 gates for hidden columns of tile j.
    w_layers, b_layers = [], []
    w_ih_l, w_hh_l, b_ih_l, b_hh_l = [], [], [], []
    for l in range(nlayers):
        in_dim = emb_size if l == 0 else hidden_size
        # PyTorch LSTM default: all params uniform(-1/sqrt(H), 1/sqrt(H)); gate order i,f,g,o.
        w_ih = jax.random.uniform(next(keys), (4 * H, in_dim), jnp.float32, -k, k)
        w_hh = jax.random.uniform(next(keys), (4 * H, H), jnp.float32, -k, k)
        b_ih = jax.random.uniform(next(keys), (4 * H,), jnp.float32, -k, k)
        b_hh = jax.random.uniform(next(keys), (4 * H,), jnp.float32, -k, k)
        b_sum = b_ih + b_hh

        wg = jnp.zeros((d_in, 4, h_pad), jnp.float32)
        bg = jnp.zeros((4, h_pad), jnp.float32)
        for g in range(4):
            wg = wg.at[:in_dim, g, :H].set(w_ih[g * H:(g + 1) * H, :].T)
            wg = wg.at[x_dim:x_dim + H, g, :H].set(w_hh[g * H:(g + 1) * H, :].T)
            bg = bg.at[g, :H].set(b_sum[g * H:(g + 1) * H])
        w_packed = (wg.reshape(d_in, 4, n_ht, h_tile)
                      .transpose(0, 2, 1, 3).reshape(d_in, 4 * h_pad))
        b_packed = (bg.reshape(4, n_ht, h_tile)
                      .transpose(1, 0, 2).reshape(1, 4 * h_pad))
        w_layers.append(w_packed)
        b_layers.append(b_packed)
        w_ih_l.append(w_ih); w_hh_l.append(w_hh); b_ih_l.append(b_ih); b_hh_l.append(b_hh)

    w_all = jnp.stack(w_layers, axis=0).astype(jnp.bfloat16)   # (nlayers, d_in, 4*h_pad)
    b_all = jnp.stack(b_layers, axis=0)                        # (nlayers, 1, 4*h_pad) f32

    # Projection: xavier_uniform weight (bf16, streamed), default-uniform bias (f32), zero-padded.
    xav = math.sqrt(6.0 / (hidden_size + nwords))
    w_proj = jax.random.uniform(next(keys), (nwords, hidden_size), jnp.float32, -xav, xav)
    b_proj = jax.random.uniform(next(keys), (nwords,), jnp.float32, -k, k)
    wp_pad = (jnp.zeros((h_pad, v_pad), jnp.float32)
                .at[:hidden_size, :nwords].set(w_proj.T).astype(jnp.bfloat16))
    bp_pad = jnp.zeros((1, v_pad), jnp.float32).at[0, :nwords].set(b_proj)

    return {
        "embedding": emb_pad,
        "w_all": w_all,
        "b_all": b_all,
        "wp_t": wp_pad,
        "bp": bp_pad,
        "dims": dict(emb=emb_size, hidden=hidden_size, nwords=nwords, nlayers=nlayers,
                     e_pad=e_pad, h_pad=h_pad, x_dim=x_dim, d_in=d_in, v_pad=v_pad,
                     h_tile=h_tile, vocab_tile=vocab_tile, vmem_budget=vmem_budget),
        # raw (PyTorch-layout) copies, only used by the pure-JAX reference check
        "raw": dict(embedding=emb, w_ih=w_ih_l, w_hh=w_hh_l, b_ih=b_ih_l, b_hh=b_hh_l,
                    w_proj=w_proj, b_proj=b_proj),
    }


def reference_forward(params, trg_words, in_hidden, in_cell):
    raw = params["raw"]
    H = params["dims"]["hidden"]
    x = raw["embedding"][trg_words]
    hs, cs = [], []
    for l in range(params["dims"]["nlayers"]):
        gates = (x @ raw["w_ih"][l].T + in_hidden[l] @ raw["w_hh"][l].T
                 + raw["b_ih"][l] + raw["b_hh"][l])
        i = jax.nn.sigmoid(gates[:, 0 * H:1 * H])
        f = jax.nn.sigmoid(gates[:, 1 * H:2 * H])
        g = jnp.tanh(gates[:, 2 * H:3 * H])
        o = jax.nn.sigmoid(gates[:, 3 * H:4 * H])
        c = f * in_cell[l] + i * g
        h = o * jnp.tanh(c)
        hs.append(h); cs.append(c)
        x = h
    logits = x @ raw["w_proj"].T + raw["b_proj"]
    return logits, jnp.stack(hs, axis=0), jnp.stack(cs, axis=0)


if __name__ == "__main__":
    nwords, emb_size, hidden_size, nlayers = 128, 32, 32, 2
    batch = 2

    key = jax.random.PRNGKey(0)
    k_par, k_tok, k_h, k_c = jax.random.split(key, 4)

    params = make_params(k_par, nwords, emb_size, hidden_size, nlayers)
    trg_words = jax.random.randint(k_tok, (batch,), 0, nwords, dtype=jnp.int32)
    in_hidden = jax.random.normal(k_h, (nlayers, batch, hidden_size), jnp.float32)
    in_cell = jax.random.normal(k_c, (nlayers, batch, hidden_size), jnp.float32)

    logits, out_hidden, out_cell = decoder_forward(params, trg_words, in_hidden, in_cell)
    jax.block_until_ready((logits, out_hidden, out_cell))

    assert logits.shape == (batch, nwords)
    assert out_hidden.shape == (nlayers, batch, hidden_size)
    assert out_cell.shape == (nlayers, batch, hidden_size)

    # Pure-JAX reference check (loose tolerance: weights are streamed in bf16, accumulated in f32).
    ref_logits, ref_h, ref_c = reference_forward(params, trg_words, in_hidden, in_cell)
    assert bool(jnp.allclose(logits, ref_logits, atol=3e-2, rtol=3e-2))
    assert bool(jnp.allclose(out_hidden, ref_h, atol=3e-2, rtol=3e-2))
    assert bool(jnp.allclose(out_cell, ref_c, atol=3e-2, rtol=3e-2))

    print("KERNEL_OK")
</pallas_src>

<mosaic_0001>
module attributes {stable_mosaic.version = 11 : i64} {
  func.func @_lstm_stack_kernel(%arg0: i32, %arg1: i32, %arg2: memref<8xi32, #tpu.memory_space<smem>>, %arg3: memref<128x128xf32, #tpu.memory_space<any>>, %arg4: memref<1x256x512xbf16, #tpu.memory_space<vmem>>, %arg5: memref<1x1x512xf32, #tpu.memory_space<vmem>>, %arg6: memref<1x8x128xf32, #tpu.memory_space<vmem>>, %arg7: memref<1x8x128xf32, #tpu.memory_space<vmem>>, %arg8: memref<1x8x128xf32, #tpu.memory_space<vmem>>, %arg9: memref<1x8x128xf32, #tpu.memory_space<vmem>>, %arg10: memref<8x256xf32, #tpu.memory_space<vmem>>, %arg11: memref<8x128xf32, #tpu.memory_space<vmem>>, %arg12: memref<8x!tpu.dma_semaphore, #tpu.memory_space<semaphore_mem>>) attributes {dimension_semantics = [#tpu.dimension_semantics<arbitrary>, #tpu.dimension_semantics<arbitrary>], iteration_bounds = array<i64: 2, 1>, scalar_prefetch = 1 : i64, scratch_operands = 3 : i64, tpu.core_type = #tpu.core_type<tc>, window_params = [{}, {transform_indices = @transform_1, window_bounds = array<i64: 1, 256, 512>}, {transform_indices = @transform_2, window_bounds = array<i64: 1, 1, 512>}, {transform_indices = @transform_3, window_bounds = array<i64: 1, 8, 128>}, {transform_indices = @transform_4, window_bounds = array<i64: 1, 8, 128>}, {transform_indices = @transform_5, window_bounds = array<i64: 1, 8, 128>}, {transform_indices = @transform_6, window_bounds = array<i64: 1, 8, 128>}]} {
    %c0_i32 = arith.constant 0 : i32
    %0 = arith.cmpi eq, %arg0, %c0_i32 : i32
    %c0_i32_0 = arith.constant 0 : i32
    %1 = arith.cmpi eq, %arg1, %c0_i32_0 : i32
    %2 = arith.andi %0, %1 : i1
    %3 = arith.extui %2 : i1 to i32
    %c0_i32_1 = arith.constant 0 : i32
    %4 = arith.cmpi ne, %3, %c0_i32_1 : i32
    scf.if %4 {
      %c0_25 = arith.constant 0 : index
      %56 = memref.load %arg2[%c0_25] : memref<8xi32, #tpu.memory_space<smem>>
      %c0_i32_26 = arith.constant 0 : i32
      %57 = arith.maxsi %56, %c0_i32_26 : i32
      %c127_i32 = arith.constant 127 : i32
      %58 = arith.minsi %57, %c127_i32 : i32
      %c0_i32_27 = arith.constant 0 : i32
      %c0_i32_28 = arith.constant 0 : i32
      %59 = tpu.memref_slice %arg3[%58, %c0_i32_28] : memref<128x128xf32, #tpu.memory_space<any>> -> memref<1x128xf32, #tpu.memory_space<any>>
      %c0_i32_29 = arith.constant 0 : i32
      %c0_i32_30 = arith.constant 0 : i32
      %60 = tpu.memref_slice %arg10[%c0_i32_29, %c0_i32_30] : memref<8x256xf32, #tpu.memory_space<vmem>> -> memref<1x128xf32, #tpu.memory_space<vmem>>
      %61 = tpu.memref_slice %arg12[%c0_i32_27] : memref<8x!tpu.dma_semaphore, #tpu.memory_space<semaphore_mem>> -> memref<1x!tpu.dma_semaphore, #tpu.memory_space<semaphore_mem>>
      %62 = tpu.memref_squeeze %61 : memref<1x!tpu.dma_semaphore, #tpu.memory_space<semaphore_mem>> -> memref<!tpu.dma_semaphore, #tpu.memory_space<semaphore_mem>>
      tpu.enqueue_dma source(%59 : memref<1x128xf32, #tpu.memory_space<any>>) target(%60 : memref<1x128xf32, #tpu.memory_space<vmem>>) target_semaphore(%62 : memref<!tpu.dma_semaphore, #tpu.memory_space<semaphore_mem>>)
      %c1 = arith.constant 1 : index
      %63 = memref.load %arg2[%c1] : memref<8xi32, #tpu.memory_space<smem>>
      %c0_i32_31 = arith.constant 0 : i32
      %64 = arith.maxsi %63, %c0_i32_31 : i32
      %c127_i32_32 = arith.constant 127 : i32
      %65 = arith.minsi %64, %c127_i32_32 : i32
      %c1_i32_33 = arith.constant 1 : i32
      %c0_i32_34 = arith.constant 0 : i32
      %66 = tpu.memref_slice %arg3[%65, %c0_i32_34] : memref<128x128xf32, #tpu.memory_space<any>> -> memref<1x128xf32, #tpu.memory_space<any>>
      %c1_i32_35 = arith.constant 1 : i32
      %c0_i32_36 = arith.constant 0 : i32
      %67 = tpu.memref_slice %arg10[%c1_i32_35, %c0_i32_36] : memref<8x256xf32, #tpu.memory_space<vmem>> -> memref<1x128xf32, #tpu.memory_space<vmem>>
      %68 = tpu.memref_slice %arg12[%c1_i32_33] : memref<8x!tpu.dma_semaphore, #tpu.memory_space<semaphore_mem>> -> memref<1x!tpu.dma_semaphore, #tpu.memory_space<semaphore_mem>>
      %69 = tpu.memref_squeeze %68 : memref<1x!tpu.dma_semaphore, #tpu.memory_space<semaphore_mem>> -> memref<!tpu.dma_semaphore, #tpu.memory_space<semaphore_mem>>
      tpu.enqueue_dma source(%66 : memref<1x128xf32, #tpu.memory_space<any>>) target(%67 : memref<1x128xf32, #tpu.memory_space<vmem>>) target_semaphore(%69 : memref<!tpu.dma_semaphore, #tpu.memory_space<semaphore_mem>>)
      %c0_37 = arith.constant 0 : index
      %c0_38 = arith.constant 0 : index
      %c0_39 = arith.constant 0 : index
      %70 = vector.load %arg6[%c0_37, %c0_38, %c0_39] : memref<1x8x128xf32, #tpu.memory_space<vmem>>, vector<1x8x128xf32>
      %71 = vector.shape_cast %70 : vector<1x8x128xf32> to vector<8x128xf32>
      %c0_40 = arith.constant 0 : index
      %c128 = arith.constant 128 : index
      %72 = vector.load %arg10[%c0_40, %c128] : memref<8x256xf32, #tpu.memory_space<vmem>>, vector<8x128xf32>
      tpu.vector_store %arg10[%c0_40, %c128], %71 {strides = array<i32>} : memref<8x256xf32, #tpu.memory_space<vmem>>, vector<8x128xf32>,
      %cst_41 = arith.constant 0.000000e+00 : f32
      %73 = vector.broadcast %cst_41 : f32 to vector<6x128xf32>
      %c2 = arith.constant 2 : index
      %c0_42 = arith.constant 0 : index
      %74 = vector.load %arg10[%c2, %c0_42] : memref<8x256xf32, #tpu.memory_space<vmem>>, vector<6x128xf32>
      tpu.vector_store %arg10[%c2, %c0_42], %73 {strides = array<i32>} : memref<8x256xf32, #tpu.memory_space<vmem>>, vector<6x128xf32>,
      %c0_i32_43 = arith.constant 0 : i32
      %c0_i32_44 = arith.constant 0 : i32
      %75 = tpu.memref_slice %arg3[%58, %c0_i32_44] : memref<128x128xf32, #tpu.memory_space<any>> -> memref<1x128xf32, #tpu.memory_space<any>>
      %c0_i32_45 = arith.constant 0 : i32
      %c0_i32_46 = arith.constant 0 : i32
      %76 = tpu.memref_slice %arg10[%c0_i32_45, %c0_i32_46] : memref<8x256xf32, #tpu.memory_space<vmem>> -> memref<1x128xf32, #tpu.memory_space<vmem>>
      %77 = tpu.memref_slice %arg12[%c0_i32_43] : memref<8x!tpu.dma_semaphore, #tpu.memory_space<semaphore_mem>> -> memref<1x!tpu.dma_semaphore, #tpu.memory_space<semaphore_mem>>
      %78 = tpu.memref_squeeze %77 : memref<1x!tpu.dma_semaphore, #tpu.memory_space<semaphore_mem>> -> memref<!tpu.dma_semaphore, #tpu.memory_space<semaphore_mem>>
      tpu.wait_dma2 semaphore(%78 : memref<!tpu.dma_semaphore, #tpu.memory_space<semaphore_mem>>) src(%75 : memref<1x128xf32, #tpu.memory_space<any>>) dst(%76 : memref<1x128xf32, #tpu.memory_space<vmem>>)
      %c1_i32_47 = arith.constant 1 : i32
      %c0_i32_48 = arith.constant 0 : i32
      %79 = tpu.memref_slice %arg3[%65, %c0_i32_48] : memref<128x128xf32, #tpu.memory_space<any>> -> memref<1x128xf32, #tpu.memory_space<any>>
      %c1_i32_49 = arith.constant 1 : i32
      %c0_i32_50 = arith.constant 0 : i32
      %80 = tpu.memref_slice %arg10[%c1_i32_49, %c0_i32_50] : memref<8x256xf32, #tpu.memory_space<vmem>> -> memref<1x128xf32, #tpu.memory_space<vmem>>
      %81 = tpu.memref_slice %arg12[%c1_i32_47] : memref<8x!tpu.dma_semaphore, #tpu.memory_space<semaphore_mem>> -> memref<1x!tpu.dma_semaphore, #tpu.memory_space<semaphore_mem>>
      %82 = tpu.memref_squeeze %81 : memref<1x!tpu.dma_semaphore, #tpu.memory_space<semaphore_mem>> -> memref<!tpu.dma_semaphore, #tpu.memory_space<semaphore_mem>>
      tpu.wait_dma2 semaphore(%82 : memref<!tpu.dma_semaphore, #tpu.memory_space<semaphore_mem>>) src(%79 : memref<1x128xf32, #tpu.memory_space<any>>) dst(%80 : memref<1x128xf32, #tpu.memory_space<vmem>>)
    } else {
    }
    %c0_i32_2 = arith.constant 0 : i32
    %5 = arith.cmpi sgt, %arg0, %c0_i32_2 : i32
    %c0_i32_3 = arith.constant 0 : i32
    %6 = arith.cmpi eq, %arg1, %c0_i32_3 : i32
    %7 = arith.andi %5, %6 : i1
    %8 = arith.extui %7 : i1 to i32
    %c0_i32_4 = arith.constant 0 : i32
    %9 = arith.cmpi ne, %8, %c0_i32_4 : i32
    scf.if %9 {
      %c0_25 = arith.constant 0 : index
      %c0_26 = arith.constant 0 : index
      %56 = vector.load %arg11[%c0_25, %c0_26] : memref<8x128xf32, #tpu.memory_space<vmem>>, vector<8x128xf32>
      %c0_27 = arith.constant 0 : index
      %c0_28 = arith.constant 0 : index
      %57 = vector.load %arg10[%c0_27, %c0_28] : memref<8x256xf32, #tpu.memory_space<vmem>>, vector<8x128xf32>
      tpu.vector_store %arg10[%c0_27, %c0_28], %56 {strides = array<i32>} : memref<8x256xf32, #tpu.memory_space<vmem>>, vector<8x128xf32>,
      %c0_29 = arith.constant 0 : index
      %c0_30 = arith.constant 0 : index
      %c0_31 = arith.constant 0 : index
      %58 = vector.load %arg6[%c0_29, %c0_30, %c0_31] : memref<1x8x128xf32, #tpu.memory_space<vmem>>, vector<1x8x128xf32>
      %59 = vector.shape_cast %58 : vector<1x8x128xf32> to vector<8x128xf32>
      %c0_32 = arith.constant 0 : index
      %c128 = arith.constant 128 : index
      %60 = vector.load %arg10[%c0_32, %c128] : memref<8x256xf32, #tpu.memory_space<vmem>>, vector<8x128xf32>
      tpu.vector_store %arg10[%c0_32, %c128], %59 {strides = array<i32>} : memref<8x256xf32, #tpu.memory_space<vmem>>, vector<8x128xf32>,
    } else {
    }
    %c0 = arith.constant 0 : index
    %c0_5 = arith.constant 0 : index
    %10 = vector.load %arg10[%c0, %c0_5] : memref<8x256xf32, #tpu.memory_space<vmem>>, vector<8x256xf32>
    %11 = arith.truncf %10 : vector<8x256xf32> to vector<8x256xbf16>
    %c0_6 = arith.constant 0 : index
    %c0_7 = arith.constant 0 : index
    %c0_8 = arith.constant 0 : index
    %12 = vector.load %arg4[%c0_6, %c0_7, %c0_8] : memref<1x256x512xbf16, #tpu.memory_space<vmem>>, vector<1x256x512xbf16>
    %13 = vector.shape_cast %12 : vector<1x256x512xbf16> to vector<256x512xbf16>
    %cst = arith.constant dense<0.000000e+00> : vector<8x512xf32>
    %14 = tpu.matmul %11, %13, %cst {dimension_numbers = #tpu.dot_dimension_numbers<[1], [0], [0], [1], [0, 0, 1, 1], [], []>} : vector<8x256xbf16>, vector<256x512xbf16>, vector<8x512xf32> -> vector<8x512xf32>
    %c0_9 = arith.constant 0 : index
    %c0_10 = arith.constant 0 : index
    %c0_11 = arith.constant 0 : index
    %15 = vector.load %arg5[%c0_9, %c0_10, %c0_11] : memref<1x1x512xf32, #tpu.memory_space<vmem>>, vector<1x1x512xf32>
    %16 = vector.shape_cast %15 : vector<1x1x512xf32> to vector<1x512xf32>
    %17 = vector.broadcast %16 : vector<1x512xf32> to vector<8x512xf32>
    %18 = arith.addf %14, %17 : vector<8x512xf32>
    %19 = vector.extract_strided_slice %18 {offsets = [0, 0], sizes = [8, 128], strides = [1, 1]} : vector<8x512xf32> to vector<8x128xf32>
    %20 = arith.negf %19 : vector<8x128xf32>
    %21 = math.exp %20 : vector<8x128xf32>
    %cst_12 = arith.constant 1.000000e+00 : f32
    %22 = vector.broadcast %cst_12 : f32 to vector<8x128xf32>
    %23 = arith.addf %22, %21 : vector<8x128xf32>
    %24 = arith.divf %22, %23 : vector<8x128xf32>
    %25 = vector.extract_strided_slice %18 {offsets = [0, 128], sizes = [8, 128], strides = [1, 1]} : vector<8x512xf32> to vector<8x128xf32>
    %26 = arith.negf %25 : vector<8x128xf32>
    %27 = math.exp %26 : vector<8x128xf32>
    %cst_13 = arith.constant 1.000000e+00 : f32
    %28 = vector.broadcast %cst_13 : f32 to vector<8x128xf32>
    %29 = arith.addf %28, %27 : vector<8x128xf32>
    %30 = arith.divf %28, %29 : vector<8x128xf32>
    %31 = vector.extract_strided_slice %18 {offsets = [0, 256], sizes = [8, 128], strides = [1, 1]} : vector<8x512xf32> to vector<8x128xf32>
    %32 = math.tanh %31 : vector<8x128xf32>
    %33 = vector.extract_strided_slice %18 {offsets = [0, 384], sizes = [8, 128], strides = [1, 1]} : vector<8x512xf32> to vector<8x128xf32>
    %34 = arith.negf %33 : vector<8x128xf32>
    %35 = math.exp %34 : vector<8x128xf32>
    %cst_14 = arith.constant 1.000000e+00 : f32
    %36 = vector.broadcast %cst_14 : f32 to vector<8x128xf32>
    %37 = arith.addf %36, %35 : vector<8x128xf32>
    %38 = arith.divf %36, %37 : vector<8x128xf32>
    %c0_15 = arith.constant 0 : index
    %c0_16 = arith.constant 0 : index
    %c0_17 = arith.constant 0 : index
    %39 = vector.load %arg7[%c0_15, %c0_16, %c0_17] : memref<1x8x128xf32, #tpu.memory_space<vmem>>, vector<1x8x128xf32>
    %40 = vector.shape_cast %39 : vector<1x8x128xf32> to vector<8x128xf32>
    %41 = arith.mulf %30, %40 : vector<8x128xf32>
    %42 = arith.mulf %24, %32 : vector<8x128xf32>
    %43 = arith.addf %41, %42 : vector<8x128xf32>
    %44 = math.tanh %43 : vector<8x128xf32>
    %45 = arith.mulf %38, %44 : vector<8x128xf32>
    %c0_18 = arith.constant 0 : index
    %c0_19 = arith.constant 0 : index
    %c0_20 = arith.constant 0 : index
    %46 = vector.load %arg8[%c0_18, %c0_19, %c0_20] : memref<1x8x128xf32, #tpu.memory_space<vmem>>, vector<1x8x128xf32>
    %47 = vector.shape_cast %46 : vector<1x8x128xf32> to vector<8x128xf32>
    %48 = vector.shape_cast %45 : vector<8x128xf32> to vector<1x8x128xf32>
    tpu.vector_store %arg8[%c0_18, %c0_19, %c0_20], %48 {strides = array<i32>} : memref<1x8x128xf32, #tpu.memory_space<vmem>>, vector<1x8x128xf32>,
    %c0_21 = arith.constant 0 : index
    %c0_22 = arith.constant 0 : index
    %c0_23 = arith.constant 0 : index
    %49 = vector.load %arg9[%c0_21, %c0_22, %c0_23] : memref<1x8x128xf32, #tpu.memory_space<vmem>>, vector<1x8x128xf32>
    %50 = vector.shape_cast %49 : vector<1x8x128xf32> to vector<8x128xf32>
    %51 = vector.shape_cast %43 : vector<8x128xf32> to vector<1x8x128xf32>
    tpu.vector_store %arg9[%c0_21, %c0_22, %c0_23], %51 {strides = array<i32>} : memref<1x8x128xf32, #tpu.memory_space<vmem>>, vector<1x8x128xf32>,
    %c1_i32 = arith.constant 1 : i32
    %52 = arith.addi %arg0, %c1_i32 : i32
    %c2_i32 = arith.constant 2 : i32
    %53 = arith.cmpi slt, %52, %c2_i32 : i32
    %54 = arith.extui %53 : i1 to i32
    %c0_i32_24 = arith.constant 0 : i32
    %55 = arith.cmpi ne, %54, %c0_i32_24 : i32
    scf.if %55 {
      %c128_i32 = arith.constant 128 : i32
      %56 = arith.muli %arg1, %c128_i32 : i32
      %57 = tpu.assume_multiple %56, 128 : i32
      %c0_25 = arith.constant 0 : index
      %58 = arith.index_cast %57 : i32 to index
      %59 = vector.load %arg11[%c0_25, %58] : memref<8x128xf32, #tpu.memory_space<vmem>>, vector<8x128xf32>
      tpu.vector_store %arg11[%c0_25, %58], %45 {strides = array<i32>} : memref<8x128xf32, #tpu.memory_space<vmem>>, vector<8x128xf32>,
    } else {
    }
    return
  }
  func.func @transform_1(%arg0: i32, %arg1: i32, %arg2: memref<8xi32, #tpu.memory_space<smem>>) -> (i32, i32, i32) {
    %c0_i32 = arith.constant 0 : i32
    %c0_i32_0 = arith.constant 0 : i32
    return %arg0, %c0_i32, %arg1 : i32, i32, i32
  }
  func.func @transform_2(%arg0: i32, %arg1: i32, %arg2: memref<8xi32, #tpu.memory_space<smem>>) -> (i32, i32, i32) {
    %c0_i32 = arith.constant 0 : i32
    %c0_i32_0 = arith.constant 0 : i32
    return %arg0, %c0_i32, %arg1 : i32, i32, i32
  }
  func.func @transform_3(%arg0: i32, %arg1: i32, %arg2: memref<8xi32, #tpu.memory_space<smem>>) -> (i32, i32, i32) {
    %c0_i32 = arith.constant 0 : i32
    %c0_i32_0 = arith.constant 0 : i32
    %c0_i32_1 = arith.constant 0 : i32
    return %arg0, %c0_i32, %c0_i32_0 : i32, i32, i32
  }
  func.func @transform_4(%arg0: i32, %arg1: i32, %arg2: memref<8xi32, #tpu.memory_space<smem>>) -> (i32, i32, i32) {
    %c0_i32 = arith.constant 0 : i32
    %c0_i32_0 = arith.constant 0 : i32
    return %arg0, %c0_i32, %arg1 : i32, i32, i32
  }
  func.func @transform_5(%arg0: i32, %arg1: i32, %arg2: memref<8xi32, #tpu.memory_space<smem>>) -> (i32, i32, i32) {
    %c0_i32 = arith.constant 0 : i32
    %c0_i32_0 = arith.constant 0 : i32
    return %arg0, %c0_i32, %arg1 : i32, i32, i32
  }
  func.func @transform_6(%arg0: i32, %arg1: i32, %arg2: memref<8xi32, #tpu.memory_space<smem>>) -> (i32, i32, i32) {
    %c0_i32 = arith.constant 0 : i32
    %c0_i32_0 = arith.constant 0 : i32
    return %arg0, %c0_i32, %arg1 : i32, i32, i32
  }
}

</mosaic_0001>

<bundles_post_ra>
// kernel: tpu_custom_call.1
= control target key start
LH: loop header
LB: loop body
LE: loop exit
PB: predicated region body
PF: predicated region fallthrough
CT: control target
= control target key end

     0   :  { %s2308_s0 = inlined_call_operand.hbm [shape: s32[8], index: 0, kind: input, shape index: {}]   ;;  %s2309_s1 = inlined_call_operand.hbm [shape: f32[128,128], index: 1, kind: input, shape index: {}]   ;;  %s2310_s2 = inlined_call_operand.hbm [shape: bf16[2,256,512], index: 2, kind: input, shape index: {}]   ;;  %s2311_s3 = inlined_call_operand.hbm [shape: f32[2,1,512], index: 3, kind: input, shape index: {}]   ;;  %s2312_s4 = inlined_call_operand.hbm [shape: f32[2,8,128], index: 4, kind: input, shape index: {}]   ;;  %s2313_s5 = inlined_call_operand.vmem [shape: f32[2,8,128], index: 5, kind: input, shape index: {}]   ;;  %s2314_s6 = inlined_call_operand.hbm [shape: f32[2,8,128], index: 6, kind: output, shape index: {0}]   ;;  %s2315_s7 = inlined_call_operand.hbm [shape: f32[2,8,128], index: 7, kind: output, shape index: {1}]  }
   0x1   :  { %2323 = sst [smem:[#allocation33_spill]] %s2310_s2  ;;  %s1565_s26 = scalar_lea.hbm %s2308_s0, 16 }
   0x2   :  { %2324 = sst [smem:[#allocation34_spill]] %s2311_s3  ;;  %p1566_p0 = scmp.ne.s32.totalorder %s2308_s0, %s1565_s26 }
   0x3   :  { %p1569_p1 = scmp.lt.u32.totalorder %s1565_s26, %s2308_s0 }
   0x5   :  { %p1571_p2 = pnand %p1569_p1, %p1566_p0 }
   0x7   :  { %1574 = shalt.err (!%p1571_p2)  }
   0x8   :  { %s1839_s8 = smov [#allocation6]  }
   0x9   :  { %14 = dma.hbm_to_smem %s2308_s0, 16, %s1839_s8, [#allocation5] }
   0xa   :  { %1793 = dma.done.wait [#allocation5], 16 }
   0xb   :  { %1794 = vsyncadd [#allocation5], 4294967280 }
   0xc   :  { %16 = sfence }
   0xd   :  { %17 = vsyncpa [#allocation8], 0 }
   0xe   :  { %19 = vsyncpa [#allocation8 + $0x1], 0 }
   0xf   :  { %20 = vsyncpa [#allocation11], 0 }
  0x10   :  { %22 = vsyncpa [#allocation11 + $0x1], 0 }
  0x11   :  { %23 = vsyncpa [#allocation9], 0 }
  0x12   :  { %25 = vsyncpa [#allocation9 + $0x1], 0 }
  0x13   :  { %26 = vsyncpa [#allocation15], 0 }
  0x14   :  { %28 = vsyncpa [#allocation15 + $0x1], 0  ;;  %s1902_s11 = smov 0   ;;  %s1904_s12 = smov 0  }
  0x15   :  { %s1906_s13 = smov 0   ;;  %s1908_s14 = smov 0  }
  0x16   :  { %s1910_s0 = smov 0   ;;  %s1912_s15 = smov 0  }
  0x17 LB: > { %2325 = sst [smem:[#allocation29_spill]] %s1825_s13  ;;  %s1933_s16 = sadd.s32 4294967295, %s1837_s15   ;;  %s1837_s15 = sphi %s1912_s15, %s34_s15   ;;  %s1833_s0 = sphi %s1910_s0, %s2359_s0   ;;  %s1829_s14 = sphi %s1908_s14, %s2358_s14   ;;  %s1825_s13 = sphi %s1906_s13, %s2354_s13   ;;  %s1821_s12 = sphi %s1904_s12, %s2357_s12   ;;  %s1817_s11 = sphi %s1902_s11, %s2356_s11  }
  0x18   : > { %2326 = sst [smem:[#allocation30_spill]] %s1837_s15  ;;  %s1247_s17 = sadd.s32 4294967294, %s1837_s15  }
  0x19   : > { %s46_s18 = sadd.s32 1, %s1833_s0  ;;  %s55_s19 = sadd.s32 1, %s1825_s13 }
  0x1a   : > { %p48_p3 = scmp.ge.s32.totalorder %s46_s18, 2  ;;  %p62_p4 = scmp.ne.s32.totalorder %s1825_s13, %s1821_s12 }
  0x1b   : > { %p63_p5 = scmp.eq.s32.totalorder %s1837_s15, 0  ;;  %p68_p6 = scmp.ne.s32.totalorder %s1821_s12, %s1817_s11 }
  0x1c   : > { %s2361_s18 = smov (%p48_p3, %s46_s18), 0  ;;  %p69_p8 = scmp.eq.s32.totalorder %s1933_s16, 0 }
  0x1d   : > { %2327 = sst [smem:[#allocation31_spill]] %s2361_s18  ;;  %p1945_p7 = por %p63_p5, %p62_p4 }
  0x1e   : > { %s50_s21 = ssub.s32 %s1833_s0, %s2361_s18  ;;  %p176_p9 = scmp.eq.s32.totalorder %s1933_s16, 1 }
  0x1f   : > { %p53_p10 = scmp.eq.s32.totalorder %s50_s21, 0  ;;  %p1953_p11 = por %p69_p8, %p68_p6 }
  0x20   : > { %p1957_p12 = por %p176_p9, %p62_p4  ;;  %p182_p13 = scmp.eq.s32.totalorder %s1247_s17, 1 }
  0x21   : > { %s2329_s22 = scalar_select %p1953_p11, 1, 0 }
  0x22   : > { %s2330_s23 = scalar_select %p1957_p12, 1, 0 }
  0x23   : > { %s1962_s24 = scalar_select %p53_p10, %s1825_s13, %s55_s19  }
  0x24   : > { %p1964_p0 = por %p182_p13, %p68_p6  ;;  %p1397_p2 = scmp.lt.s32.totalorder %s1837_s15, 2 }
  0x25   : > { %2331 = sst [smem:[#allocation32_spill]] %s1962_s24  ;;  %s1971_s26 = sand.u32 1, %s1825_s13  }
  0x26   : > { %s2332_s25 = scalar_select %p1964_p0, 1, 0 }
  0x27   : > { %s253_s27 = sand.u32 1, %s1837_s15   ;;  %s1253_s28 = sshll.u32 %s1971_s26, 2 }
  0x28   : > { %p1977_p3 = pnand %p1397_p2, %p1945_p7  ;;  %s1363_s30 = sshll.u32 %s1833_s0, 6 }
  0x29   : > { %s2334_s3 = sld [smem:[#allocation34_spill]]  ;;  %s257_s17 = scalar_lea.vmem [#allocation10], %s1253_s28 }
  0x2a   : > { %s2333_s29 = scalar_select %p1977_p3, 1, 0 }
  0x2b   : > { %s267_s19 = sshll.u32 %s257_s17, 4  ;;  %s1991_s20 = scalar_lea.sflag [#allocation11], %s253_s27  ;;  %s1988_s19 = int_to_ptr.vmem [resolvable:$true] %s267_s19 }
  0x2c   : > { %p1997_p7 = pneg %p1977_p3 }
  0x2f   : > { %s1985_s10 = scalar_lea.hbm %s2334_s3, %s1363_s30  ;;  %s1580_s8 = scalar_lea.hbm %s2334_s3, 128 }
  0x30   : > { %s1575_s21 = scalar_lea.hbm %s1985_s10, 64  ;;  %p1581_p10 = scmp.lt.u32.totalorder %s1985_s10, %s2334_s3 }
  0x31   : > { %p1576_p6 = scmp.ne.s32.totalorder %s1985_s10, %s1575_s21  ;;  %p1582_p13 = scmp.lt.u32.totalorder %s1580_s8, %s1575_s21 }
  0x32   : > { %p1584_p1 = scmp.lt.u32.totalorder %s1575_s21, %s1985_s10 }
  0x33   : > { %p1578_p8 = pnand %p1997_p7, %p1576_p6  ;;  %p1583_p2 = por %p1582_p13, %p1581_p10 }
  0x35   : > { %p1579_p9 = pneg %p1578_p8  ;;  %p1585_p4 = por %p1584_p1, %p1583_p2 }
  0x37   : > { %p1586_p5 = pnand %p1585_p4, %p1579_p9 }
  0x39   : > { %1589 = shalt.err (!%p1586_p5)
}
  0x3a   : > { %s1590_s27 = scalar_lea.vmem %s1988_s19, 64  ;;  %s1840_s30 = smov [#allocation10]  }
  0x3b   : > { %p1591_p6 = scmp.ne.s32.totalorder %s1988_s19, %s1590_s27  ;;  %s1595_s28 = sshll.u32 %s1840_s30, 4  ;;  %s1596_s28 = int_to_ptr.vmem [resolvable:$false] %s1595_s28 }
  0x3c   : > { %s1597_s9 = scalar_lea.vmem %s1596_s28, 128  ;;  %p1598_p12 = scmp.lt.s32.totalorder %s1988_s19, %s1596_s28 }
  0x3d   : > { %p1593_p8 = pnand %p1591_p6, %p1997_p7  ;;  %p1599_p11 = scmp.lt.s32.totalorder %s1597_s9, %s1590_s27 }
  0x3f   : > { %p1594_p0 = pneg %p1593_p8  ;;  %p1600_p10 = por %p1599_p11, %p1598_p12 }
  0x41   : > { %p1601_p13 = pnand %p1600_p10, %p1594_p0 }
  0x43   : > { %1604 = shalt.err (!%p1601_p13)
}
  0x44   : > { %1386 = dma.hbm_to_vmem [thread:$0]  (!%p1977_p3), %s1985_s10, 64, %s1988_s19, %s1991_s20  }
  0x45   : > { %p2336_p1 = scmp.lt.s32.totalorder %s1837_s15, 3  ;;  %p2337_p4 = scmp.ge.s32.totalorder %s1837_s15, 1 }
  0x46   : > { %s1250_s8 = sshll.u32 %s1971_s26, 9  ;;  %s1362_s17 = sshll.u32 %s1833_s0, 13 }
  0x47   : > { %p2025_p5 = pnand %p2337_p4, %p2336_p1  ;;  %s2339_s2 = sld [smem:[#allocation33_spill]] }
  0x48   : > { %s234_s9 = scalar_lea.vmem [#allocation7], %s1250_s8  ;;  %s231_s10 = scalar_lea.sflag [#allocation8], %s1971_s26 }
  0x49   : > { %s2338_s21 = scalar_select %p2025_p5, 1, 0 }
  0x4a   : > { %s243_s3 = sshll.u32 %s234_s9, 4  ;;  %s2036_s3 = int_to_ptr.vmem [resolvable:$true] %s243_s3 }
  0x4d   : > { %s2034_s28 = scalar_lea.hbm %s2339_s2, %s1362_s17  ;;  %s1610_s27 = scalar_lea.hbm %s2339_s2, 16384 }
  0x4e   : > { %s1605_s19 = scalar_lea.hbm %s2034_s28, 8192  ;;  %p1611_p9 = scmp.lt.u32.totalorder %s2034_s28, %s2339_s2 }
  0x4f   : > { %p1606_p11 = scmp.ne.s32.totalorder %s2034_s28, %s1605_s19  ;;  %p1612_p2 = scmp.lt.u32.totalorder %s1610_s27, %s1605_s19 }
  0x50   : > { %p1614_p8 = scmp.lt.u32.totalorder %s1605_s19, %s2034_s28 }
  0x51   : > { %p1608_p12 = pnand %p1606_p11, %p1997_p7  ;;  %p1613_p6 = por %p1612_p2, %p1611_p9 }
  0x53   : > { %p1609_p0 = pneg %p1608_p12  ;;  %p1615_p10 = por %p1614_p8, %p1613_p6 }
  0x55   : > { %p1616_p13 = pnand %p1615_p10, %p1609_p0 }
  0x57   : > { %1619 = shalt.err (!%p1616_p13)
}
  0x58   : > { %s1620_s8 = scalar_lea.vmem %s2036_s3, 8192  ;;  %s1841_s13 = smov [#allocation7]  }
  0x59   : > { %p1621_p1 = scmp.ne.s32.totalorder %s2036_s3, %s1620_s8  ;;  %s1625_s24 = sshll.u32 %s1841_s13, 4  ;;  %s1626_s24 = int_to_ptr.vmem [resolvable:$false] %s1625_s24 }
  0x5a   : > { %s1627_s9 = scalar_lea.vmem %s1626_s24, 16384  ;;  %p1628_p12 = scmp.lt.s32.totalorder %s2036_s3, %s1626_s24 }
  0x5b   : > { %p1623_p4 = pnand %p1621_p1, %p1997_p7  ;;  %p1629_p5 = scmp.lt.s32.totalorder %s1627_s9, %s1620_s8 }
  0x5d   : > { %p1624_p11 = pneg %p1623_p4  ;;  %p1630_p9 = por %p1629_p5, %p1628_p12 }
  0x5f   : > { %p1631_p2 = pnand %p1630_p9, %p1624_p11 }
  0x61   : > { %1634 = shalt.err (!%p1631_p2)
}
  0x62   : > { %s1842_s19 = smov 256   ;;  %s1843_s27 = smov 16  }
  0x63   : > { %1383 = dma.hbm_to_vmem [thread:$0]  (!%p1977_p3), %s2034_s28, 8192, %s2036_s3, %s231_s10, %s1842_s19, %s1842_s19, %s1843_s27  }
  0x64   : > { %s1256_s17 = sshll.u32 %s1971_s26, 3  ;;  %s1257_s30 = sshll.u32 %s1833_s0, 7 }
  0x65   : > { %s2067_s8 = scalar_lea.hbm %s2312_s4, %s1257_s30  ;;  %s278_s9 = scalar_lea.vmem [#allocation12], %s1256_s17 }
  0x66   : > { %s285_s2 = sshll.u32 %s278_s9, 4  ;;  %s1635_s15 = scalar_lea.hbm %s2067_s8, 128  ;;  %s286_s2 = int_to_ptr.vmem [resolvable:$true] %s285_s2 }
  0x67   : > { %p1636_p5 = scmp.ne.s32.totalorder %s2067_s8, %s1635_s15  ;;  %s1640_s28 = scalar_lea.hbm %s2312_s4, 256 }
  0x68   : > { %p1641_p8 = scmp.lt.u32.totalorder %s2067_s8, %s2312_s4  ;;  %p1642_p10 = scmp.lt.u32.totalorder %s1640_s28, %s1635_s15 }
  0x69   : > { %p1638_p0 = pnand %p1636_p5, %p1997_p7  ;;  %p1644_p1 = scmp.lt.u32.totalorder %s1635_s15, %s2067_s8 }
  0x6a   : > { %p1643_p13 = por %p1642_p10, %p1641_p8 }
  0x6b   : > { %p1639_p6 = pneg %p1638_p0 }
  0x6c   : > { %p1645_p4 = por %p1644_p1, %p1643_p13 }
  0x6e   : > { %p1646_p11 = pnand %p1645_p4, %p1639_p6 }
  0x70   : > { %1649 = shalt.err (!%p1646_p11)
}
  0x71   : > { %s1650_s27 = scalar_lea.vmem %s286_s2, 128  ;;  %s1844_s17 = smov [#allocation12]  }
  0x72   : > { %p1651_p12 = scmp.ne.s32.totalorder %s286_s2, %s1650_s27  ;;  %s1655_s30 = sshll.u32 %s1844_s17, 4  ;;  %s1656_s30 = int_to_ptr.vmem [resolvable:$false] %s1655_s30 }
  0x73   : > { %s1657_s13 = scalar_lea.vmem %s1656_s30, 256  ;;  %p1658_p5 = scmp.lt.s32.totalorder %s286_s2, %s1656_s30 }
  0x74   : > { %p1653_p9 = pnand %p1651_p12, %p1997_p7  ;;  %p1659_p0 = scmp.lt.s32.totalorder %s1657_s13, %s1650_s27 }
  0x76   : > { %p1654_p2 = pneg %p1653_p9  ;;  %p1660_p3 = por %p1659_p0, %p1658_p5 }
  0x78   : > { %p1661_p8 = pnand %p1660_p3, %p1654_p2 }
  0x7a   : > { %1664 = shalt.err (!%p1661_p8)
}
  0x7b   : > { %p2340_p10 = scmp.ne.s32.totalorder %s2333_s29, 0  ;;  %p2341_p6 = scmp.ne.s32.totalorder %s2338_s21, 0 }
  0x7c   : > { %s2090_s15 = sand.u32 (!%p2341_p6), 1, %s1821_s12   ;;  %p2342_p3 = scmp.ne.s32.totalorder (!%p2341_p6), %s2329_s22, 0 }
  0x7d   : > { %1389 = dma.hbm_to_vmem [thread:$0]  (!%p2340_p10), %s2067_s8, 128, %s286_s2, %s1991_s20  }
  0x7e   : > { %304 = sbr.rel (%p2341_p6) target bundleno = 580 (0x244), region = 36  ;;  %s1259_s18 = sshll.u32 (!%p2341_p6), %s2090_s15, 9 }
  0x7f   : > { %s307_s24 = scalar_lea.sflag (!%p2341_p6), [#allocation8], %s2090_s15  ;;  %s2094_s9 = scalar_lea.vmem (!%p2341_p6), [#allocation7], %s1259_s18 }
  0x85   : > { %1796 = dma.done.wait (%p2342_p3), %s307_s24, 8192  }
  0x86   : > { %1798 = vsyncadd (%p2342_p3), %s307_s24, 4294959104  ;;  %s315_s2 = sand.u32 1, %s1933_s16   ;;  %s1260_s29 = sshll.u32 %s2090_s15, 2 }
  0x87   : > { %s316_s20 = scalar_lea.sflag [#allocation11], %s315_s2  ;;  %s2102_s21 = scalar_lea.vmem [#allocation10], %s1260_s29 }
  0x88   : > { %1800 = dma.done.wait (%p2342_p3), %s316_s20, 192  }
  0x89   : > { %1802 = vsyncadd (%p2342_p3), %s316_s20, 4294967104  ;;  %s2109_s8 = sshll.u32 %s2090_s15, 3  ;;  %p379_p7 = scmp.lt.s32.totalorder %s1829_s14, 1 }
  0x8a   : > { %p386_p13 = scmp.eq.s32.totalorder %s1829_s14, 0 }
  0x8b   : > { %s380_s16 = scalar_select %p379_p7, %s1829_s14, 1 }
  0x8c   : > { %391 = sbr.rel (!%p386_p13) target bundleno = 197 (0xc5), region = 52  ;;  %s392_s17 = sld [smem:[#allocation6]] (%p386_p13) }
  0x8d   : > { %s1264_s3 = sshll.u32 %s380_s16, 3  ;;  %s1272_s30 = sld [smem:[#allocation6 + $0x1]] (%p386_p13) }
  0x8e   : > { %s2117_s10 = scalar_lea.vmem %s2313_s5, %s1264_s3  ;;  %s1845_s13 = smov (%p386_p13), [#allocation2]  }
  0x8f   : > { %s406_s18 = sshll.u32 (%p386_p13), %s1845_s13, 4  ;;  %s1846_s24 = smov (%p386_p13), [#allocation2 + $0x1]   ;;  %s2122_s18 = int_to_ptr.vmem [resolvable:$true] %s406_s18 }
  0x90   : > { %s426_s2 = sshll.u32 (%p386_p13), %s1846_s24, 4  ;;  %s1667_s19 = scalar_lea.hbm (%p386_p13), %s2309_s1, 2048  ;;  %s2124_s2 = int_to_ptr.vmem [resolvable:$true] %s426_s2 }
  0x92   : > { %p393_p1 = scmp.gt.s32.totalorder (%p386_p13), %s392_s17, 0  ;;  %p1266_p4 = scmp.lt.s32.totalorder (%p386_p13), %s392_s17, 127 }
  0x93   : > { %p411_p11 = scmp.gt.s32.totalorder %s1272_s30, 0  ;;  %p1273_p12 = scmp.lt.s32.totalorder %s1272_s30, 127 }
  0x94   : > { %s2363_s17 = smov (!%p393_p1, %s392_s17), 0 }
  0x95   : > { %s2365_s30 = smov (!%p411_p11, %s1272_s30), 0  ;;  %s2367_s17 = smov (!%p1266_p4, %s2363_s17), 127 }
  0x96   : > { %s2369_s30 = smov (!%p1273_p12, %s2365_s30), 127  ;;  %s1271_s29 = sshll.u32 %s2367_s17, 4 }
  0x97   : > { %s398_s3 = scalar_lea.hbm %s2309_s1, %s1271_s29  ;;  %s1278_s26 = sshll.u32 %s2369_s30, 4 }
  0x98   : > { %s1665_s28 = scalar_lea.hbm %s398_s3, 16  ;;  %p1668_p2 = scmp.lt.u32.totalorder %s398_s3, %s2309_s1 }
  0x99   : > { %p1666_p9 = scmp.ne.s32.totalorder %s398_s3, %s1665_s28  ;;  %p1669_p5 = scmp.lt.u32.totalorder %s1667_s19, %s1665_s28 }
  0x9a   : > { %p1671_p8 = scmp.lt.u32.totalorder %s1665_s28, %s398_s3 }
  0x9b   : > { %p1670_p0 = por %p1669_p5, %p1668_p2 }
  0x9d   : > { %p1672_p10 = por %p1671_p8, %p1670_p0 }
  0x9f   : > { %p1673_p6 = pnand %p1672_p10, %p1666_p9 }
  0xa1   : > { %1676 = shalt.err (!%p1673_p6)  }
  0xa2   : > { %s1677_s17 = scalar_lea.vmem %s2122_s18, 16  ;;  %s1681_s30 = scalar_lea.vmem %s2122_s18, 256 }
  0xa3   : > { %p1678_p3 = scmp.ne.s32.totalorder %s2122_s18, %s1677_s17  ;;  %p1682_p7 = scmp.lt.s32.totalorder %s2122_s18, %s2122_s18 }
  0xa4   : > { %p1683_p13 = scmp.lt.s32.totalorder %s1681_s30, %s1677_s17 }
  0xa6   : > { %p1684_p1 = por %p1683_p13, %p1682_p7 }
  0xa8   : > { %p1685_p4 = pnand %p1684_p1, %p1678_p3 }
  0xaa   : > { %1688 = shalt.err (!%p1685_p4)  }
  0xab   : > { %409 = dma.hbm_to_vmem [thread:$0]  %s398_s3, 16, %s2122_s18, [#allocation4] }
  0xac   : > { %s2343_s22 = scalar_lea.vmem [#allocation12], %s2109_s8  ;;  %s416_s20 = scalar_lea.hbm %s2309_s1, %s1278_s26 }
  0xad   : > { %v430_v0 = vld [vmem:[%s2343_s22] sm:$0xff]  ;;  %s1689_s16 = scalar_lea.hbm %s416_s20, 16  ;;  %p1692_p12 = scmp.lt.u32.totalorder %s416_s20, %s2309_s1 }
  0xae   : > { %p1690_p11 = scmp.ne.s32.totalorder %s416_s20, %s1689_s16  ;;  %p1693_p9 = scmp.lt.u32.totalorder %s1667_s19, %s1689_s16 }
  0xaf   : > { %p1695_p5 = scmp.lt.u32.totalorder %s1689_s16, %s416_s20 }
  0xb0   : > { %p1694_p2 = por %p1693_p9, %p1692_p12 }
  0xb2   : > { %p1696_p0 = por %p1695_p5, %p1694_p2 }
  0xb4   : > { %p1697_p8 = pnand %p1696_p0, %p1690_p11 }
  0xb6   : > { %1700 = shalt.err (!%p1697_p8)  }
  0xb7   : > { %s1701_s3 = scalar_lea.vmem %s2124_s2, 16  ;;  %p1706_p6 = scmp.lt.s32.totalorder %s2124_s2, %s2122_s18 }
  0xb8   : > { %p1702_p10 = scmp.ne.s32.totalorder %s2124_s2, %s1701_s3  ;;  %p1707_p3 = scmp.lt.s32.totalorder %s1681_s30, %s1701_s3 }
  0xba   : > { %p1708_p7 = por %p1707_p3, %p1706_p6 }
  0xbc   : > { %p1709_p13 = pnand %p1708_p7, %p1702_p10 }
  0xbe   : > { %1712 = shalt.err (!%p1709_p13)  }
  0xbf   : > { %429 = dma.hbm_to_vmem [thread:$0]  %s416_s20, 16, %s2124_s2, [#allocation4 + $0x1]  ;;  %v1847_v1 = vmov 0.0  }
  0xc0   : > { %431 = vst [vmem:[#allocation2 + $0x8] sm:$0xff] %v430_v0  ;;  %432 = vst [vmem:[#allocation2] sm:$0xfc] %v1847_v1 }
  0xc1   : > { %1803 = dma.done.wait [#allocation4], 16 }
  0xc2   : > { %1804 = vsyncadd [#allocation4], 4294967280 }
  0xc3   : > { %1805 = dma.done.wait [#allocation4 + $0x1], 16 }
  0xc4   : > { %1806 = vsyncadd [#allocation4 + $0x1], 4294967280 }
  0xc5 PF: > { %p438_p1 = scmp.gt.s32.totalorder %s1829_s14, 0 }
  0xc6   : > { %v443_v2 = vld [vmem:[#allocation3] sm:$0xff] (%p438_p1)  ;;  %s2344_s19 = scalar_lea.vmem (%p438_p1), [#allocation12], %s2109_s8 }
  0xc7   : > { %442 = sbr.rel (!%p438_p1) target bundleno = 206 (0xce), region = 64  ;;  %v445_v3 = vld [vmem:[%s2344_s19] sm:$0xff] (%p438_p1)  ;;  %444 = vst [vmem:[#allocation2] sm:$0xff] (%p438_p1), %v443_v2 }
  0xc8   : > { %446 = vst [vmem:[#allocation2 + $0x8] sm:$0xff] (%p438_p1), %v445_v3 }
  0xce PF: > { %v1453_v4 = vld [vmem:[%s2094_s9 + $0x4] ss:$16 sps:$4 sm:$0xff]   ;;  %v1455_v5 = vld [vmem:[%s2094_s9] ss:$16 sps:$4 sm:$0xff]   ;;  %v1464_v9 = vld [vmem:[%s2094_s9 + $0xc] ss:$16 sps:$4 sm:$0xff]  }
  0xcf   : > { %857 = vmatprep.subr.bf16.mxu0 %v1453_v4  ;;  %v1456_v6 = vld [vmem:[%s2094_s9 + $0x24] ss:$16 sps:$4 sm:$0xff]   ;;  %v1458_v7 = vld [vmem:[%s2094_s9 + $0x20] ss:$16 sps:$4 sm:$0xff]   ;;  %v1467_v10 = vld [vmem:[%s2094_s9 + $0x8] ss:$16 sps:$4 sm:$0xff]   ;;  %898 = vmatprep.subr.bf16.mxu1 %v1464_v9 }
  0xd0   : > { %858 = vmatpush1.bf16.msra.mxu0 %v1455_v5  ;;  %v1459_v8 = vld [vmem:[%s2094_s9 + $0x44] ss:$16 sps:$4 sm:$0xff]   ;;  %v1461_v11 = vld [vmem:[%s2094_s9 + $0x40] ss:$16 sps:$4 sm:$0xff]   ;;  %899 = vmatpush1.bf16.msra.mxu1 %v1467_v10  ;;  %v1470_v13 = vld [vmem:[%s2094_s9 + $0x2c] ss:$16 sps:$4 sm:$0xff]  }
  0xd1   : > { %859 = vmatprep.subr.bf16.mxu0 %v1456_v6  ;;  %v1462_v12 = vld [vmem:[%s2094_s9 + $0x64] ss:$16 sps:$4 sm:$0xff]   ;;  %v1473_v14 = vld [vmem:[%s2094_s9 + $0x28] ss:$16 sps:$4 sm:$0xff]   ;;  %900 = vmatprep.subr.bf16.mxu1 %v1470_v13  ;;  %v1466_v15 = vld [vmem:[%s2094_s9 + $0x60] ss:$16 sps:$4 sm:$0xff]  }
  0xd2   : > { %v1468_v16 = vld [vmem:[%s2094_s9 + $0x84] ss:$16 sps:$4 sm:$0xff]   ;;  %v1476_v17 = vld [vmem:[%s2094_s9 + $0x4c] ss:$16 sps:$4 sm:$0xff]   ;;  %v1479_v18 = vld [vmem:[%s2094_s9 + $0x48] ss:$16 sps:$4 sm:$0xff]  }
  0xd3   : > { %v1482_v19 = vld [vmem:[%s2094_s9 + $0x6c] ss:$16 sps:$4 sm:$0xff]   ;;  %v1472_v20 = vld [vmem:[%s2094_s9 + $0x80] ss:$16 sps:$4 sm:$0xff]   ;;  %v1474_v21 = vld [vmem:[%s2094_s9 + $0xa4] ss:$16 sps:$4 sm:$0xff]  }
  0xd4   : > { %860 = vmatpush1.bf16.msra.mxu0 %v1458_v7  ;;  %901 = vmatpush1.bf16.msra.mxu1 %v1473_v14  ;;  %v1485_v22 = vld [vmem:[%s2094_s9 + $0x68] ss:$16 sps:$4 sm:$0xff]   ;;  %v1488_v23 = vld [vmem:[%s2094_s9 + $0x8c] ss:$16 sps:$4 sm:$0xff]   ;;  %v1478_v24 = vld [vmem:[%s2094_s9 + $0xa0] ss:$16 sps:$4 sm:$0xff]  }
  0xd5   : > { %861 = vmatprep.subr.bf16.mxu0 %v1459_v8  ;;  %902 = vmatprep.subr.bf16.mxu1 %v1476_v17  ;;  %v1480_v25 = vld [vmem:[%s2094_s9 + $0xc4] ss:$16 sps:$4 sm:$0xff]   ;;  %v1491_v26 = vld [vmem:[%s2094_s9 + $0x88] ss:$16 sps:$4 sm:$0xff]   ;;  %v1494_v27 = vld [vmem:[%s2094_s9 + $0xac] ss:$16 sps:$4 sm:$0xff]   ;;  %v517_v8 = vlaneseq }
  0xd6   : > { %v1484_v28 = vld [vmem:[%s2094_s9 + $0xc0] ss:$16 sps:$4 sm:$0xff]   ;;  %v1486_v29 = vld [vmem:[%s2094_s9 + $0xe4] ss:$16 sps:$4 sm:$0xff]   ;;  %v1497_v30 = vld [vmem:[%s2094_s9 + $0xa8] ss:$16 sps:$4 sm:$0xff]  }
  0xd7   : > { %v1500_v31 = vld [vmem:[%s2094_s9 + $0xcc] ss:$16 sps:$4 sm:$0xff]   ;;  %v1490_v32 = vld [vmem:[%s2094_s9 + $0xe0] ss:$16 sps:$4 sm:$0xff]   ;;  %v1492_v33 = vld [vmem:[%s2094_s9 + $0x104] ss:$16 sps:$4 sm:$0xff]  }
  0xd8   : > { %862 = vmatpush1.bf16.msra.mxu0 %v1461_v11  ;;  %903 = vmatpush1.bf16.msra.mxu1 %v1479_v18  ;;  %v1503_v34 = vld [vmem:[%s2094_s9 + $0xc8] ss:$16 sps:$4 sm:$0xff]   ;;  %v1506_v35 = vld [vmem:[%s2094_s9 + $0xec] ss:$16 sps:$4 sm:$0xff]   ;;  %v1496_v36 = vld [vmem:[%s2094_s9 + $0x100] ss:$16 sps:$4 sm:$0xff]  }
  0xd9   : > { %863 = vmatprep.subr.bf16.mxu0 %v1462_v12  ;;  %904 = vmatprep.subr.bf16.mxu1 %v1482_v19  ;;  %v1498_v37 = vld [vmem:[%s2094_s9 + $0x124] ss:$16 sps:$4 sm:$0xff]   ;;  %v1509_v38 = vld [vmem:[%s2094_s9 + $0xe8] ss:$16 sps:$4 sm:$0xff]   ;;  %v1512_v39 = vld [vmem:[%s2094_s9 + $0x10c] ss:$16 sps:$4 sm:$0xff]  }
  0xda   : > { %v1502_v40 = vld [vmem:[%s2094_s9 + $0x120] ss:$16 sps:$4 sm:$0xff]   ;;  %v1504_v41 = vld [vmem:[%s2094_s9 + $0x144] ss:$16 sps:$4 sm:$0xff]   ;;  %v1515_v42 = vld [vmem:[%s2094_s9 + $0x108] ss:$16 sps:$4 sm:$0xff]  }
  0xdb   : > { %v1518_v43 = vld [vmem:[%s2094_s9 + $0x12c] ss:$16 sps:$4 sm:$0xff]   ;;  %v448_v44 = vld [vmem:[#allocation2 + $0x8] sm:$0xff]  ;;  %v1521_v48 = vld [vmem:[%s2094_s9 + $0x128] ss:$16 sps:$4 sm:$0xff]   ;;  %s966_s18 = sadd.s32 1, %s1829_s14 }
  0xdc   : > { %864 = vmatpush1.bf16.msra.mxu0 %v1466_v15  ;;  %905 = vmatpush1.bf16.msra.mxu1 %v1485_v22  ;;  %v1508_v45 = vld [vmem:[%s2094_s9 + $0x140] ss:$16 sps:$4 sm:$0xff]   ;;  %v450_v46 = vpack.c.bf16 %v448_v44, %v448_v44  ;;  %v1510_v47 = vld [vmem:[%s2094_s9 + $0x164] ss:$16 sps:$4 sm:$0xff]   ;;  %v1524_v49 = vld [vmem:[%s2094_s9 + $0x14c] ss:$16 sps:$4 sm:$0xff]  }
  0xdd   : > { %865 = vmatprep.subr.bf16.mxu0 %v1468_v16  ;;  %906 = vmatprep.subr.bf16.mxu1 %v1488_v23  ;;  %v1514_v50 = vld [vmem:[%s2094_s9 + $0x160] ss:$16 sps:$4 sm:$0xff]   ;;  %v1516_v51 = vld [vmem:[%s2094_s9 + $0x184] ss:$16 sps:$4 sm:$0xff]   ;;  %v1527_v52 = vld [vmem:[%s2094_s9 + $0x148] ss:$16 sps:$4 sm:$0xff]  }
  0xde   : > { %889 = vmatprep.mubr.bf16.mxu0 %v450_v46  ;;  %930 = vmatprep.mubr.bf16.mxu1 %v450_v46  ;;  %v1530_v53 = vld [vmem:[%s2094_s9 + $0x16c] ss:$16 sps:$4 sm:$0xff]   ;;  %v1520_v54 = vld [vmem:[%s2094_s9 + $0x180] ss:$16 sps:$4 sm:$0xff]   ;;  %v1522_v55 = vld [vmem:[%s2094_s9 + $0x1a4] ss:$16 sps:$4 sm:$0xff]  }
  0xdf   : > { %v1533_v56 = vld [vmem:[%s2094_s9 + $0x168] ss:$16 sps:$4 sm:$0xff]   ;;  %v1536_v57 = vld [vmem:[%s2094_s9 + $0x18c] ss:$16 sps:$4 sm:$0xff]   ;;  %v1526_v58 = vld [vmem:[%s2094_s9 + $0x1a0] ss:$16 sps:$4 sm:$0xff]  }
  0xe0   : > { %866 = vmatpush1.bf16.msra.mxu0 %v1472_v20  ;;  %907 = vmatpush1.bf16.msra.mxu1 %v1491_v26  ;;  %v1528_v59 = vld [vmem:[%s2094_s9 + $0x1c4] ss:$16 sps:$4 sm:$0xff]   ;;  %v1539_v60 = vld [vmem:[%s2094_s9 + $0x188] ss:$16 sps:$4 sm:$0xff]   ;;  %v1540_v61 = vld [vmem:[%s2094_s9 + $0x1ac] ss:$16 sps:$4 sm:$0xff]  }
  0xe1   : > { %867 = vmatprep.subr.bf16.mxu0 %v1474_v21  ;;  %908 = vmatprep.subr.bf16.mxu1 %v1494_v27  ;;  %v1532_v62 = vld [vmem:[%s2094_s9 + $0x1c0] ss:$16 sps:$4 sm:$0xff]   ;;  %v1534_v63 = vld [vmem:[%s2094_s9 + $0x1e4] ss:$16 sps:$4 sm:$0xff]   ;;  %v1542_v0 = vld [vmem:[%s2094_s9 + $0x1a8] ss:$16 sps:$4 sm:$0xff]  }
  0xe2   : > { %v1543_v1 = vld [vmem:[%s2094_s9 + $0x1cc] ss:$16 sps:$4 sm:$0xff]   ;;  %v1538_v2 = vld [vmem:[%s2094_s9 + $0x1e0] ss:$16 sps:$4 sm:$0xff]   ;;  %v1545_v4 = vld [vmem:[%s2094_s9 + $0x1c8] ss:$16 sps:$4 sm:$0xff]  }
  0xe3   : > { %v447_v3 = vld [vmem:[#allocation2] sm:$0xff]  ;;  %v518_v9 = vshrl.u32 %v517_v8, 7  ;;  %v515_v11 = vld [vmem:[%s2102_s21] sm:$0xf]  ;;  %s2346_s21 = scalar_lea.vmem [#allocation13], %s2109_s8  ;;  %p1347_p4 = scmp.ge.s32.totalorder %s966_s18, 2 }
  0xe4   : > { %868 = vmatpush1.bf16.msra.mxu0 %v1478_v24  ;;  %909 = vmatpush1.bf16.msra.mxu1 %v1497_v30  ;;  %v1546_v5 = vld [vmem:[%s2094_s9 + $0x1ec] ss:$16 sps:$4 sm:$0xff]   ;;  %v449_v6 = vpack.c.bf16 %v447_v3, %v447_v3  ;;  %v1548_v7 = vld [vmem:[%s2094_s9 + $0x1e8] ss:$16 sps:$4 sm:$0xff]   ;;  %s2345_s9 = scalar_lea.vmem [#allocation14], %s2109_s8 }
  0xe5   : > { %869 = vmatprep.subr.bf16.mxu0 %v1480_v25  ;;  %910 = vmatprep.subr.bf16.mxu1 %v1500_v31  ;;  %v519_v10 = vsub.s32 0, %v518_v9  ;;  %v523_v12 = vsub.s32 1, %v518_v9  ;;  %v531_v15 = vsub.s32 3, %v518_v9  ;;  %v527_v25 = vsub.s32 2, %v518_v9 }
  0xe7   : > { %v520_v13 = vrot.slane %v515_v11, %v519_v10  ;;  %v524_v14 = vrot.slane %v515_v11, %v523_v12  ;;  %v532_v23 = vrot.slane %v515_v11, %v531_v15  ;;  %v528_v30 = vrot.slane %v515_v11, %v527_v25 }
  0xe8   : > { %870 = vmatpush1.bf16.msra.mxu0 %v1484_v28  ;;  %911 = vmatpush1.bf16.msra.mxu1 %v1503_v34 }
  0xe9   : > { %871 = vmatprep.subr.bf16.mxu0 %v1486_v29  ;;  %912 = vmatprep.subr.bf16.mxu1 %v1506_v35 }
  0xec   : > { %872 = vmatpush1.bf16.msra.mxu0 %v1490_v32  ;;  %913 = vmatpush1.bf16.msra.mxu1 %v1509_v38 }
  0xed   : > { %873 = vmatprep.subr.bf16.mxu0 %v1492_v33  ;;  %914 = vmatprep.subr.bf16.mxu1 %v1512_v39 }
  0xf0   : > { %874 = vmatpush1.bf16.msra.mxu0 %v1496_v36  ;;  %915 = vmatpush1.bf16.msra.mxu1 %v1515_v42 }
  0xf1   : > { %875 = vmatprep.subr.bf16.mxu0 %v1498_v37  ;;  %916 = vmatprep.subr.bf16.mxu1 %v1518_v43 }
  0xf4   : > { %876 = vmatpush1.bf16.msra.mxu0 %v1502_v40  ;;  %917 = vmatpush1.bf16.msra.mxu1 %v1521_v48  ;;  %v958_v40 = vld [vmem:[%s2117_s10] sm:$0xff] }
  0xf5   : > { %877 = vmatprep.subr.bf16.mxu0 %v1504_v41  ;;  %918 = vmatprep.subr.bf16.mxu1 %v1524_v49 }
  0xf8   : > { %878 = vmatpush1.bf16.msra.mxu0 %v1508_v45  ;;  %919 = vmatpush1.bf16.msra.mxu1 %v1527_v52 }
  0xf9   : > { %879 = vmatprep.subr.bf16.mxu0 %v1510_v47  ;;  %920 = vmatprep.subr.bf16.mxu1 %v1530_v53 }
  0xfc   : > { %880 = vmatpush1.bf16.msra.mxu0 %v1514_v50  ;;  %921 = vmatpush1.bf16.msra.mxu1 %v1533_v56 }
  0xfd   : > { %881 = vmatprep.subr.bf16.mxu0 %v1516_v51  ;;  %922 = vmatprep.subr.bf16.mxu1 %v1536_v57 }
 0x100   : > { %882 = vmatpush1.bf16.msra.mxu0 %v1520_v54  ;;  %923 = vmatpush1.bf16.msra.mxu1 %v1539_v60 }
 0x101   : > { %883 = vmatprep.subr.bf16.mxu0 %v1522_v55  ;;  %924 = vmatprep.subr.bf16.mxu1 %v1540_v61 }
 0x104   : > { %884 = vmatpush1.bf16.msra.mxu0 %v1526_v58  ;;  %925 = vmatpush1.bf16.msra.mxu1 %v1542_v0 }
 0x105   : > { %885 = vmatprep.subr.bf16.mxu0 %v1528_v59  ;;  %926 = vmatprep.subr.bf16.mxu1 %v1543_v1 }
 0x108   : > { %886 = vmatpush1.bf16.msra.mxu0 %v1532_v62  ;;  %927 = vmatpush1.bf16.msra.mxu1 %v1545_v4 }
 0x109   : > { %887 = vmatprep.subr.bf16.mxu0 %v1534_v63  ;;  %928 = vmatprep.subr.bf16.mxu1 %v1546_v5 }
 0x10c   : > { %888 = vmatpush1.bf16.msra.mxu0 %v1538_v2  ;;  %929 = vmatpush1.bf16.msra.mxu1 %v1548_v7 }
 0x10f   : > { %890 = vmatmul.mubr.bf16.vlgmr.msra.gmra.mrb[0].mxu0 %v449_v6  ;;  %931 = vmatmul.mubr.bf16.vlgmr.msra.gmra.mrb[0].mxu1 %v449_v6 }
 0x1e2   : > { %v891_v16 = vpop.f32.mrb[0].mxu0  ;;  %v932_v26 = vpop.f32.mrb[0].mxu1 }
 0x1e3   : > { %v892_v17 = vadd.f32 %v891_v16, %v520_v13  ;;  %v893_v18 = vpop.f32.mrb[1].mxu0  ;;  %v934_v27 = vpop.f32.mrb[1].mxu1  ;;  %v933_v33 = vadd.f32 %v932_v26, %v528_v30 }
 0x1e4   : > { %v894_v19 = vadd.f32 %v893_v18, %v524_v14  ;;  %v895_v20 = vpop.f32.mrb[2].mxu0  ;;  %v935_v28 = vadd.f32 %v934_v27, %v532_v23  ;;  %v936_v29 = vpop.f32.mrb[2].mxu1 }
 0x1e5   : > { %v1344_v21 = vmul.f32 -1.442695, %v892_v17  ;;  %v896_v22 = vpop.f32.mrb[3].mxu0  ;;  %v937_v31 = vpop.f32.mrb[3].mxu1 }
 0x1e6   : > { %v1345_v24 = vmul.f32 -1.442695, %v894_v19  ;;  %v1346_v32 = vmul.f32 -1.442695, %v935_v28 }
 0x1e7   : > { %1549 = vpow2.f32 %v1344_v21 }
 0x1e8   : > { %1551 = vpow2.f32 %v1345_v24 }
 0x1e9   : > { %1553 = vpow2.f32 %v1346_v32 }
 0x1ea   : > { %1555 = vtanh.f32 %v933_v33 }
 0x1f1   : > { %v1550_v34 = vpop.eup %1549 }
 0x1f2   : > { %v1552_v35 = vpop.eup %1551  ;;  %v942_v36 = vadd.f32 1.0, %v1550_v34 }
 0x1f3   : > { %v948_v37 = vadd.f32 1.0, %v1552_v35  ;;  %v1554_v38 = vpop.eup %1553 }
 0x1f4   : > { %1557 = vrcp.f32 %v942_v36  ;;  %v1556_v39 = vpop.eup %1555  ;;  %v955_v42 = vadd.f32 1.0, %v1554_v38 }
 0x1f5   : > { %1559 = vrcp.f32 %v948_v37 }
 0x1f6   : > { %1561 = vrcp.f32 %v955_v42 }
 0x1fe   : > { %v1558_v41 = vpop.eup %1557 }
 0x1ff   : > { %v1560_v43 = vpop.eup %1559  ;;  %v960_v44 = vmul.f32 %v1558_v41, %v1556_v39 }
 0x200   : > { %v959_v45 = vmul.f32 %v1560_v43, %v958_v40  ;;  %v1562_v47 = vpop.eup %1561 }
 0x202   : > { %v961_v46 = vadd.f32 %v960_v44, %v959_v45 }
 0x204   : > { %1563 = vtanh.f32 %v961_v46  ;;  %965 = vst [vmem:[%s2345_s9] sm:$0xff] %v961_v46 }
 0x20b   : > { %970 = sbr.rel (%p1347_p4) target bundleno = 530 (0x212), region = 68 }
 0x20e   : > { %v1564_v48 = vpop.eup %1563 }
 0x20f   : > { %v963_v49 = vmul.f32 %v1564_v48, %v1562_v47 }
 0x211   : > { %964 = vst [vmem:[%s2346_s21] sm:$0xff] %v963_v49  ;;  %975 = vst [vmem:[#allocation3] sm:$0xff] (!%p1347_p4), %v963_v49 }
 0x212 PF: > { %s1350_s10 = sshll.u32 %s1829_s14, 7  ;;  %s2347_s17 = scalar_lea.vmem [#allocation13], %s2109_s8 }
 0x213   : > { %s2236_s24 = scalar_lea.hbm %s2314_s6, %s1350_s10  ;;  %s996_s30 = sshll.u32 %s2347_s17, 4  ;;  %s997_s30 = int_to_ptr.vmem [resolvable:$true] %s996_s30 }
 0x214   : > { %s977_s22 = scalar_lea.sflag [#allocation9], %s2090_s15  ;;  %s1713_s27 = scalar_lea.vmem %s997_s30, 128 }
 0x215   : > { %p1714_p11 = scmp.ne.s32.totalorder %s997_s30, %s1713_s27  ;;  %p2348_p12 = scmp.ne.s32.totalorder %s2330_s23, 0 }
 0x216   : > { %s1848_s29 = smov [#allocation13]  }
 0x217   : > { %p1715_p9 = pnand %p1714_p11, %p2348_p12  ;;  %s1717_s20 = sshll.u32 %s1848_s29, 4  ;;  %s1718_s20 = int_to_ptr.vmem [resolvable:$false] %s1717_s20 }
 0x218   : > { %s1719_s16 = scalar_lea.vmem %s1718_s20, 256  ;;  %p1720_p5 = scmp.lt.s32.totalorder %s997_s30, %s1718_s20 }
 0x219   : > { %p1716_p2 = pneg %p1715_p9  ;;  %p1721_p0 = scmp.lt.s32.totalorder %s1719_s16, %s1713_s27 }
 0x21b   : > { %p1722_p8 = por %p1721_p0, %p1720_p5 }
 0x21d   : > { %p1723_p10 = pnand %p1722_p8, %p1716_p2 }
 0x21f   : > { %1726 = shalt.err (!%p1723_p10)
}
 0x220   : > { %s1727_s28 = scalar_lea.hbm %s2236_s24, 128  ;;  %s1731_s19 = scalar_lea.hbm %s2314_s6, 256 }
 0x221   : > { %p1728_p6 = scmp.ne.s32.totalorder %s2236_s24, %s1727_s28  ;;  %p1732_p13 = scmp.lt.u32.totalorder %s2236_s24, %s2314_s6 }
 0x222   : > { %p1733_p1 = scmp.lt.u32.totalorder %s1731_s19, %s1727_s28  ;;  %p1735_p11 = scmp.lt.u32.totalorder %s1727_s28, %s2236_s24 }
 0x223   : > { %p1729_p3 = pnand %p1728_p6, %p2348_p12 }
 0x224   : > { %p1734_p4 = por %p1733_p1, %p1732_p13 }
 0x225   : > { %p1730_p7 = pneg %p1729_p3 }
 0x226   : > { %p1736_p9 = por %p1735_p11, %p1734_p4 }
 0x228   : > { %p1737_p2 = pnand %p1736_p9, %p1730_p7 }
 0x22a   : > { %1740 = shalt.err (!%p1737_p2)
}
 0x22b   : > { %1376 = dma.vmem_to_hbm [thread:$0]  (%p2348_p12), %s997_s30, 128, %s2236_s24, %s977_s22  }
 0x22c   : > { %s2263_s26 = scalar_lea.hbm %s2315_s7, %s1350_s10  ;;  %s2349_s17 = scalar_lea.vmem [#allocation14], %s2109_s8 }
 0x22d   : > { %s1010_s27 = sshll.u32 %s2349_s17, 4  ;;  %s982_s29 = scalar_lea.sflag [#allocation15], %s2090_s15  ;;  %s1011_s27 = int_to_ptr.vmem [resolvable:$true] %s1010_s27 }
 0x22e   : > { %s1741_s20 = scalar_lea.vmem %s1011_s27, 128  ;;  %s1849_s16 = smov [#allocation14]  }
 0x22f   : > { %p1742_p5 = scmp.ne.s32.totalorder %s1011_s27, %s1741_s20  ;;  %s1745_s28 = sshll.u32 %s1849_s16, 4  ;;  %s1746_s28 = int_to_ptr.vmem [resolvable:$false] %s1745_s28 }
 0x230   : > { %s1747_s13 = scalar_lea.vmem %s1746_s28, 256  ;;  %p1748_p10 = scmp.lt.s32.totalorder %s1011_s27, %s1746_s28 }
 0x231   : > { %p1743_p0 = pnand %p1742_p5, %p2348_p12  ;;  %p1749_p6 = scmp.lt.s32.totalorder %s1747_s13, %s1741_s20 }
 0x233   : > { %p1744_p8 = pneg %p1743_p0  ;;  %p1750_p3 = por %p1749_p6, %p1748_p10 }
 0x235   : > { %p1751_p7 = pnand %p1750_p3, %p1744_p8 }
 0x237   : > { %1754 = shalt.err (!%p1751_p7)
}
 0x238   : > { %s1755_s14 = scalar_lea.hbm %s2263_s26, 128  ;;  %s1759_s10 = scalar_lea.hbm %s2315_s7, 256 }
 0x239   : > { %p1756_p13 = scmp.ne.s32.totalorder %s2263_s26, %s1755_s14  ;;  %p1760_p11 = scmp.lt.u32.totalorder %s2263_s26, %s2315_s7 }
 0x23a   : > { %p1761_p9 = scmp.lt.u32.totalorder %s1759_s10, %s1755_s14  ;;  %p1763_p5 = scmp.lt.u32.totalorder %s1755_s14, %s2263_s26 }
 0x23b   : > { %p1757_p1 = pnand %p1756_p13, %p2348_p12 }
 0x23c   : > { %p1762_p2 = por %p1761_p9, %p1760_p11 }
 0x23d   : > { %p1758_p4 = pneg %p1757_p1 }
 0x23e   : > { %p1764_p0 = por %p1763_p5, %p1762_p2 }
 0x240   : > { %p1765_p8 = pnand %p1764_p0, %p1758_p4 }
 0x242   : > { %1768 = shalt.err (!%p1765_p8)
}
 0x243   : > { %1377 = dma.vmem_to_hbm [thread:$0]  (%p2348_p12), %s1011_s27, 128, %s2263_s26, %s982_s29  }
 0x244 PF: > { %s2350_s22 = sld [smem:[#allocation30_spill]]  ;;  %s1022_s3 = sand.u32 1, %s1817_s11  }
 0x245   : > { %p2351_p10 = scmp.ne.s32.totalorder %s2332_s25, 0  ;;  %s1023_s19 = scalar_lea.sflag [#allocation9], %s1022_s3 }
 0x24a   : > { %p2352_p6 = scmp.ge.s32.totalorder %s2350_s22, 2 }
 0x24c   : > { %p1391_p3 = pnand %p2352_p6, %p2351_p10 }
 0x24e   : > { %1808 = dma.done.wait (!%p1391_p3), %s1023_s19, 128  }
 0x24f   : > { %1810 = vsyncadd (!%p1391_p3), %s1023_s19, 4294967168  ;;  %s1032_s18 = scalar_lea.sflag [#allocation15], %s1022_s3 }
 0x250   : > { %1812 = dma.done.wait (!%p1391_p3), %s1032_s18, 128  }
 0x251   : > { %1814 = vsyncadd (!%p1391_p3), %s1032_s18, 4294967168  ;;  %s34_s15 = sadd.s32 1, %s2350_s22   ;;  %s2353_s23 = sld [smem:[#allocation29_spill]] }
 0x252   : > { %p31_p7 = scmp.ge.s32.totalorder %s34_s15, 4   ;;  %s2354_s13 = sld [smem:[#allocation32_spill]] }
 0x253   : > { %s2355_s9 = sld [smem:[#allocation31_spill]]  ;;  %s2356_s11 = smov %s1821_s12 }
 0x254   : > { %s2358_s14 = smov %s1833_s0  ;;  %33 = sbr.rel (!%p31_p7) target bundleno = 23 (0x17), region = 157 }
 0x257   : > { %s2357_s12 = smov %s2353_s23 }
 0x259   : > { %s2359_s0 = smov %s2355_s9 }
 0x25b   :  { %1037 = vsyncpa [#allocation8], 1 }
 0x25c   :  { %1039 = vsyncpa [#allocation8 + $0x1], 1 }
 0x25d   :  { %1040 = vsyncpa [#allocation11], 1 }
 0x25e   :  { %1042 = vsyncpa [#allocation11 + $0x1], 1 }
 0x25f   :  { %1043 = vsyncpa [#allocation9], 1 }
 0x260   :  { %1045 = vsyncpa [#allocation9 + $0x1], 1 }
 0x261   :  { %1046 = vsyncpa [#allocation15], 1 }
 0x262   :  { %1048 = vsyncpa [#allocation15 + $0x1], 1 }
 0x263   :  { %1049 = vsyncmov [#allocation4] }
 0x266   :  { %s1050_s25 = vpop.sfrf %1049 }
 0x267   :  { %p1354_p12 = scmp.ne.s32.totalorder %s1050_s25, 0 }
 0x269   :  { %1054 = shalt.err (%p1354_p12)  }
 0x26a   :  { %1056 = vsyncmov [#allocation4 + $0x1] }
 0x26d   :  { %s1057_s21 = vpop.sfrf %1056 }
 0x26e   :  { %p1355_p13 = scmp.ne.s32.totalorder %s1057_s21, 0 }
 0x270   :  { %1061 = shalt.err (%p1355_p13)  }
 0x271   :  { %1063 = vsyncmov [#allocation4 + $0x2] }
 0x274   :  { %s1064_s2 = vpop.sfrf %1063 }
 0x275   :  { %p1356_p1 = scmp.ne.s32.totalorder %s1064_s2, 0 }
 0x277   :  { %1068 = shalt.err (%p1356_p1)  }
 0x278   :  { %1070 = vsyncmov [#allocation4 + $0x3] }
 0x27b   :  { %s1071_s1 = vpop.sfrf %1070 }
 0x27c   :  { %p1357_p4 = scmp.ne.s32.totalorder %s1071_s1, 0 }
 0x27e   :  { %1075 = shalt.err (%p1357_p4)  }
 0x27f   :  { %1077 = vsyncmov [#allocation4 + $0x4] }
 0x282   :  { %s1078_s4 = vpop.sfrf %1077 }
 0x283   :  { %p1358_p11 = scmp.ne.s32.totalorder %s1078_s4, 0 }
 0x285   :  { %1082 = shalt.err (%p1358_p11)  }
 0x286   :  { %1084 = vsyncmov [#allocation4 + $0x5] }
 0x289   :  { %s1085_s5 = vpop.sfrf %1084 }
 0x28a   :  { %p1359_p9 = scmp.ne.s32.totalorder %s1085_s5, 0 }
 0x28c   :  { %1089 = shalt.err (%p1359_p9)  }
 0x28d   :  { %1091 = vsyncmov [#allocation4 + $0x6] }
 0x290   :  { %s1092_s6 = vpop.sfrf %1091 }
 0x291   :  { %p1360_p2 = scmp.ne.s32.totalorder %s1092_s6, 0 }
 0x293   :  { %1096 = shalt.err (%p1360_p2)  }
 0x294   :  { %1098 = vsyncmov [#allocation4 + $0x7] }
 0x297   :  { %s1099_s7 = vpop.sfrf %1098 }
 0x298   :  { %p1361_p5 = scmp.ne.s32.totalorder %s1099_s7, 0 }
 0x29a   :  { %1103 = shalt.err (%p1361_p5)  }

</bundles_post_ra>
